<compile_context>
chip_gen: v7x
topology: tpu7x:2x2x1
jax: 0.10.0
libtpu: 0.0.40
codegen_flags: <defaults>
</compile_context>

<pallas_src>
import functools

import jax
import jax.numpy as jnp
from jax import lax
from jax.experimental import pallas as pl
from jax.experimental.pallas import tpu as pltpu


def _round_up(x, m):
    return ((x + m - 1) // m) * m


def _features_linear_kernel(x_ref, emb_ref, bias_ref, out_ref):
    # x_ref   : VMEM (TB, F) int32  — batch tile of field indices
    # emb_ref : VMEM (V,  D) f32    — full embedding table (resident)
    # bias_ref: VMEM (1,  D) f32
    # out_ref : VMEM (TB, D) f32
    idx = x_ref[...]                                  # (TB, F)
    tb, num_fields = idx.shape
    vocab = emb_ref.shape[0]

    # counts[b, v] = #{f : idx[b, f] == v}   (one-hot sum over fields)
    iota_v = lax.broadcasted_iota(jnp.int32, (tb, vocab), 1)   # (TB, V)
    counts = jnp.zeros((tb, vocab), jnp.float32)
    for f in range(num_fields):                       # static, small F
        counts = counts + (idx[:, f:f + 1] == iota_v).astype(jnp.float32)

    # Embedding-sum as a small MXU matmul with f32 accumulation.
    acc = jnp.dot(counts, emb_ref[...], preferred_element_type=jnp.float32)
    out_ref[...] = acc + bias_ref[...]                # bias broadcasts (1, D)


@functools.partial(jax.jit, static_argnames=("tile_b",))
def features_linear(x, emb_table, bias, *, tile_b=256):
    """x: (B, F) int; emb_table: (V, D) f32; bias: (D,) f32 -> (B, D) f32."""
    B, F = x.shape
    V, D = emb_table.shape

    # Batch tile: multiple of 8 (sublane-dense stores), no bigger than needed.
    TB = min(tile_b, _round_up(B, 8))
    TB = _round_up(TB, 8)
    B_pad = _round_up(B, TB)

    x_i32 = x.astype(jnp.int32)
    if B_pad != B:
        # Pad with index 0 (always valid); padded rows are sliced off below.
        x_i32 = jnp.pad(x_i32, ((0, B_pad - B), (0, 0)))

    emb_f32 = emb_table.astype(jnp.float32)
    bias2d = bias.reshape(1, D).astype(jnp.float32)

    grid_spec = pltpu.PrefetchScalarGridSpec(
        num_scalar_prefetch=0,
        grid=(B_pad // TB,),
        in_specs=[
            pl.BlockSpec((TB, F), lambda i: (i, 0)),   # index tile
            pl.BlockSpec((V, D), lambda i: (0, 0)),    # full embedding table
            pl.BlockSpec((1, D), lambda i: (0, 0)),    # bias
        ],
        out_specs=pl.BlockSpec((TB, D), lambda i: (i, 0)),
    )

    out_pad = pl.pallas_call(
        _features_linear_kernel,
        out_shape=jax.ShapeDtypeStruct((B_pad, D), jnp.float32),
        grid_spec=grid_spec,
        compiler_params=pltpu.CompilerParams(
            dimension_semantics=("parallel",)),
    )(x_i32, emb_f32, bias2d)

    return out_pad[:B]


def _reference(x, emb_table, bias):
    return jnp.sum(emb_table[x], axis=1) + bias


if __name__ == "__main__":
    key = jax.random.PRNGKey(0)

    # --- Small case (matches module-scale shapes) -----------------------
    k_idx, k_emb, key = jax.random.split(key, 3)
    field_dims, output_dim, batch, num_fields = 32, 16, 4, 8
    emb_table = jax.random.normal(k_emb, (field_dims, output_dim),
                                  dtype=jnp.float32)
    bias = jnp.zeros((output_dim,), dtype=jnp.float32)   # PyTorch init: zeros
    x = jax.random.randint(k_idx, (batch, num_fields), 0, field_dims,
                           dtype=jnp.int32)

    out = jax.block_until_ready(features_linear(x, emb_table, bias))
    ref = _reference(x, emb_table, bias)
    assert out.shape == (batch, output_dim)
    assert jnp.allclose(out, ref, atol=1e-5, rtol=1e-5)

    # --- Ragged multi-tile case (exercises batch tiling + padding) ------
    k_idx2, k_emb2, k_bias2 = jax.random.split(key, 3)
    field_dims2, output_dim2, batch2, num_fields2 = 50, 16, 300, 10
    emb_table2 = jax.random.normal(k_emb2, (field_dims2, output_dim2),
                                   dtype=jnp.float32)
    bias2 = jax.random.normal(k_bias2, (output_dim2,), dtype=jnp.float32)
    x2 = jax.random.randint(k_idx2, (batch2, num_fields2), 0, field_dims2,
                            dtype=jnp.int32)

    out2 = jax.block_until_ready(
        features_linear(x2, emb_table2, bias2, tile_b=128))
    ref2 = _reference(x2, emb_table2, bias2)
    assert out2.shape == (batch2, output_dim2)
    assert jnp.allclose(out2, ref2, atol=1e-4, rtol=1e-4)

    print("KERNEL_OK")
</pallas_src>

<mosaic_0001>
module attributes {stable_mosaic.version = 11 : i64} {
  func.func @_features_linear_kernel(%arg0: i32, %arg1: memref<8x8xi32, #tpu.memory_space<vmem>>, %arg2: memref<32x16xf32, #tpu.memory_space<vmem>>, %arg3: memref<1x16xf32, #tpu.memory_space<vmem>>, %arg4: memref<8x16xf32, #tpu.memory_space<vmem>>) attributes {dimension_semantics = [#tpu.dimension_semantics<parallel>], iteration_bounds = array<i64: 1>, scalar_prefetch = 0 : i64, scratch_operands = 0 : i64, tpu.core_type = #tpu.core_type<tc>, window_params = [{transform_indices = @transform_0, window_bounds = array<i64: 8, 8>}, {pipeline_mode = #tpu.pipeline_mode<synchronous>, transform_indices = @transform_1, window_bounds = array<i64: 32, 16>}, {pipeline_mode = #tpu.pipeline_mode<synchronous>, transform_indices = @transform_2, window_bounds = array<i64: 1, 16>}, {transform_indices = @transform_3, window_bounds = array<i64: 8, 16>}]} {
    %c0 = arith.constant 0 : index
    %c0_0 = arith.constant 0 : index
    %0 = vector.load %arg1[%c0, %c0_0] : memref<8x8xi32, #tpu.memory_space<vmem>>, vector<8x8xi32>
    %1 = tpu.iota {dimensions = array<i32: 1>} : vector<8x32xi32>
    %cst = arith.constant 0.000000e+00 : f32
    %2 = vector.broadcast %cst : f32 to vector<8x32xf32>
    %3 = vector.extract_strided_slice %0 {offsets = [0, 0], sizes = [8, 1], strides = [1, 1]} : vector<8x8xi32> to vector<8x1xi32>
    %4 = vector.broadcast %3 : vector<8x1xi32> to vector<8x32xi32>
    %5 = arith.cmpi eq, %4, %1 : vector<8x32xi32>
    %6 = arith.extui %5 : vector<8x32xi1> to vector<8x32xi32>
    %7 = arith.sitofp %6 : vector<8x32xi32> to vector<8x32xf32>
    %8 = arith.addf %2, %7 : vector<8x32xf32>
    %9 = vector.extract_strided_slice %0 {offsets = [0, 1], sizes = [8, 1], strides = [1, 1]} : vector<8x8xi32> to vector<8x1xi32>
    %10 = vector.broadcast %9 : vector<8x1xi32> to vector<8x32xi32>
    %11 = arith.cmpi eq, %10, %1 : vector<8x32xi32>
    %12 = arith.extui %11 : vector<8x32xi1> to vector<8x32xi32>
    %13 = arith.sitofp %12 : vector<8x32xi32> to vector<8x32xf32>
    %14 = arith.addf %8, %13 : vector<8x32xf32>
    %15 = vector.extract_strided_slice %0 {offsets = [0, 2], sizes = [8, 1], strides = [1, 1]} : vector<8x8xi32> to vector<8x1xi32>
    %16 = vector.broadcast %15 : vector<8x1xi32> to vector<8x32xi32>
    %17 = arith.cmpi eq, %16, %1 : vector<8x32xi32>
    %18 = arith.extui %17 : vector<8x32xi1> to vector<8x32xi32>
    %19 = arith.sitofp %18 : vector<8x32xi32> to vector<8x32xf32>
    %20 = arith.addf %14, %19 : vector<8x32xf32>
    %21 = vector.extract_strided_slice %0 {offsets = [0, 3], sizes = [8, 1], strides = [1, 1]} : vector<8x8xi32> to vector<8x1xi32>
    %22 = vector.broadcast %21 : vector<8x1xi32> to vector<8x32xi32>
    %23 = arith.cmpi eq, %22, %1 : vector<8x32xi32>
    %24 = arith.extui %23 : vector<8x32xi1> to vector<8x32xi32>
    %25 = arith.sitofp %24 : vector<8x32xi32> to vector<8x32xf32>
    %26 = arith.addf %20, %25 : vector<8x32xf32>
    %27 = vector.extract_strided_slice %0 {offsets = [0, 4], sizes = [8, 1], strides = [1, 1]} : vector<8x8xi32> to vector<8x1xi32>
    %28 = vector.broadcast %27 : vector<8x1xi32> to vector<8x32xi32>
    %29 = arith.cmpi eq, %28, %1 : vector<8x32xi32>
    %30 = arith.extui %29 : vector<8x32xi1> to vector<8x32xi32>
    %31 = arith.sitofp %30 : vector<8x32xi32> to vector<8x32xf32>
    %32 = arith.addf %26, %31 : vector<8x32xf32>
    %33 = vector.extract_strided_slice %0 {offsets = [0, 5], sizes = [8, 1], strides = [1, 1]} : vector<8x8xi32> to vector<8x1xi32>
    %34 = vector.broadcast %33 : vector<8x1xi32> to vector<8x32xi32>
    %35 = arith.cmpi eq, %34, %1 : vector<8x32xi32>
    %36 = arith.extui %35 : vector<8x32xi1> to vector<8x32xi32>
    %37 = arith.sitofp %36 : vector<8x32xi32> to vector<8x32xf32>
    %38 = arith.addf %32, %37 : vector<8x32xf32>
    %39 = vector.extract_strided_slice %0 {offsets = [0, 6], sizes = [8, 1], strides = [1, 1]} : vector<8x8xi32> to vector<8x1xi32>
    %40 = vector.broadcast %39 : vector<8x1xi32> to vector<8x32xi32>
    %41 = arith.cmpi eq, %40, %1 : vector<8x32xi32>
    %42 = arith.extui %41 : vector<8x32xi1> to vector<8x32xi32>
    %43 = arith.sitofp %42 : vector<8x32xi32> to vector<8x32xf32>
    %44 = arith.addf %38, %43 : vector<8x32xf32>
    %45 = vector.extract_strided_slice %0 {offsets = [0, 7], sizes = [8, 1], strides = [1, 1]} : vector<8x8xi32> to vector<8x1xi32>
    %46 = vector.broadcast %45 : vector<8x1xi32> to vector<8x32xi32>
    %47 = arith.cmpi eq, %46, %1 : vector<8x32xi32>
    %48 = arith.extui %47 : vector<8x32xi1> to vector<8x32xi32>
    %49 = arith.sitofp %48 : vector<8x32xi32> to vector<8x32xf32>
    %50 = arith.addf %44, %49 : vector<8x32xf32>
    %c0_1 = arith.constant 0 : index
    %c0_2 = arith.constant 0 : index
    %51 = vector.load %arg2[%c0_1, %c0_2] : memref<32x16xf32, #tpu.memory_space<vmem>>, vector<32x16xf32>
    %cst_3 = arith.constant dense<0.000000e+00> : vector<8x16xf32>
    %52 = tpu.matmul %50, %51, %cst_3 {dimension_numbers = #tpu.dot_dimension_numbers<[1], [0], [0], [1], [0, 0, 1, 1], [], []>} : vector<8x32xf32>, vector<32x16xf32>, vector<8x16xf32> -> vector<8x16xf32>
    %c0_4 = arith.constant 0 : index
    %c0_5 = arith.constant 0 : index
    %53 = vector.load %arg3[%c0_4, %c0_5] : memref<1x16xf32, #tpu.memory_space<vmem>>, vector<1x16xf32>
    %54 = vector.broadcast %53 : vector<1x16xf32> to vector<8x16xf32>
    %55 = arith.addf %52, %54 : vector<8x16xf32>
    %c0_6 = arith.constant 0 : index
    %c0_7 = arith.constant 0 : index
    %56 = vector.load %arg4[%c0_6, %c0_7] : memref<8x16xf32, #tpu.memory_space<vmem>>, vector<8x16xf32>
    tpu.vector_store %arg4[%c0_6, %c0_7], %55 {strides = array<i32>} : memref<8x16xf32, #tpu.memory_space<vmem>>, vector<8x16xf32>,
    return
  }
  func.func @transform_0(%arg0: i32) -> (i32, i32) {
    %c0_i32 = arith.constant 0 : i32
    %c0_i32_0 = arith.constant 0 : i32
    return %arg0, %c0_i32 : i32, i32
  }
  func.func @transform_1(%arg0: i32) -> (i32, i32) {
    %c0_i32 = arith.constant 0 : i32
    %c0_i32_0 = arith.constant 0 : i32
    %c0_i32_1 = arith.constant 0 : i32
    return %c0_i32, %c0_i32_0 : i32, i32
  }
  func.func @transform_2(%arg0: i32) -> (i32, i32) {
    %c0_i32 = arith.constant 0 : i32
    %c0_i32_0 = arith.constant 0 : i32
    %c0_i32_1 = arith.constant 0 : i32
    return %c0_i32, %c0_i32_0 : i32, i32
  }
  func.func @transform_3(%arg0: i32) -> (i32, i32) {
    %c0_i32 = arith.constant 0 : i32
    %c0_i32_0 = arith.constant 0 : i32
    return %arg0, %c0_i32 : i32, i32
  }
}

</mosaic_0001>

<bundles_post_ra>
// kernel: features_linear.1
= control target key start
LH: loop header
LB: loop body
LE: loop exit
PB: predicated region body
PF: predicated region fallthrough
CT: control target
= control target key end

     0   :  { %v216_v0 = vmov 2   ;;  %v217_v1 = vmov 0   ;;  %v218_v3 = vmov 3   ;;  %v219_v4 = vmov 1   ;;  %s268_s0 = inlined_call_operand.vmem [shape: s32[8,8], index: 0, kind: input, shape index: {}]   ;;  %s269_s1 = inlined_call_operand.vmem [shape: f32[32,16], index: 1, kind: input, shape index: {}]   ;;  %s270_s2 = inlined_call_operand.vmem [shape: f32[1,16], index: 2, kind: input, shape index: {}]   ;;  %s271_s3 = inlined_call_operand.vmem [shape: f32[8,16], index: 3, kind: output, shape index: {}]  }
   0x1   :  { %209 = vset.pattern.permute.xlu1 %v216_v0  ;;  %207 = vset.pattern.permute.xlu0 %v217_v1  ;;  %v14_v2 = vld [vmem:[%s268_s0] sm:$0xff]  ;;  %v220_v5 = vmov 4   ;;  %v221_v6 = vmov 5   ;;  %v222_v7 = vmov 6   ;;  %v74_v9 = vld [vmem:[%s269_s1 + $0x8] sm:$0xff]  ;;  %v223_v10 = vmov 7  }
   0x2   :  { %32 = vperm.xlu1 %209, %v14_v2   ;;  %18 = vperm.xlu0 %207, %v14_v2   ;;  %v73_v8 = vld [vmem:[%s269_s1] sm:$0xff]  ;;  %v224_v12 = vmov 0.0|0.0   ;;  %v75_v13 = vld [vmem:[%s269_s1 + $0x10] sm:$0xff]  ;;  %v76_v14 = vld [vmem:[%s269_s1 + $0x18] sm:$0xff]  ;;  %vm225_vm0 = vmmov 0   ;;  %v226_v16 = vmov 0.0   ;;  %v15_v17 = vlaneseq }
   0x3   :  { %v191_v11 = vpack.c.bf16 %v74_v9, %v73_v8  ;;  %190 = vmatprep.subr.bf16.mxu0 %v224_v12  ;;  %v194_v15 = vpack.c.bf16 %v76_v14, %v75_v13  ;;  %187 = vmatprep.mubr.msk.f32.mxu0 %vm225_vm0, %v226_v16  ;;  %vm84_vm9 = vcmask 261120   ;;  %v172_v42 = vld [vmem:[%s270_s2] ss:$0 sm:$0xff]  ;;  %vm158_vm10 = vcmask 130048  }
   0x4   :  { %v16_v20 = vand.u32 127, %v15_v17 }
   0x5   :  { %192 = vmatpush3.bf16.msra.mxu0 %v191_v11 }
   0x6   :  { %210 = vset.pattern.permute.xlu1 %v218_v3  ;;  %208 = vset.pattern.permute.xlu0 %v219_v4 }
   0x7   :  { %39 = vperm.xlu1 %210, %v14_v2   ;;  %25 = vperm.xlu0 %208, %v14_v2  }
   0x8   :  { %193 = vmatprep.subr.bf16.mxu0 %v224_v12 }
   0x9   :  { %195 = vmatpush3.bf16.msra.mxu0 %v194_v15 }
   0xb   :  { %211 = vset.pattern.permute.xlu1 %v220_v5  ;;  %212 = vset.pattern.permute.xlu0 %v221_v6 }
   0xc   :  { %46 = vperm.xlu1 %211, %v14_v2   ;;  %53 = vperm.xlu0 %212, %v14_v2  }
  0x10   :  { %213 = vset.pattern.permute.xlu1 %v222_v7  ;;  %215 = vset.pattern.permute.xlu0 %v223_v10 }
  0x11   :  { %60 = vperm.xlu1 %213, %v14_v2  }
  0x15   :  { %214 = vset.pattern.permute.xlu1 %v223_v10 }
  0x16   :  { %67 = vperm.xlu1 %214, %v14_v2  }
  0x81   :  { %v33_v18 = vpop.permute.xlu1 %32  ;;  %v19_v19 = vpop.permute.xlu0 %18 }
  0x82   :  { %vm20_vm1 = vcmp.eq.s32.totalorder %v19_v19, %v16_v20  ;;  %vm34_vm2 = vcmp.eq.s32.totalorder %v33_v18, %v16_v20 }
  0x83   :  { %v164_v23 = vsel %vm20_vm1, 1.0, %v226_v16  ;;  %v166_v26 = vsel %vm34_vm2, 1.0, %v226_v16 }
  0x86   :  { %v40_v21 = vpop.permute.xlu1 %39  ;;  %v26_v22 = vpop.permute.xlu0 %25 }
  0x87   :  { %vm27_vm3 = vcmp.eq.s32.totalorder %v26_v22, %v16_v20  ;;  %vm41_vm4 = vcmp.eq.s32.totalorder %v40_v21, %v16_v20 }
  0x88   :  { %v165_v24 = vsel %vm27_vm3, 1.0, %v226_v16  ;;  %v167_v30 = vsel %vm41_vm4, 1.0, %v226_v16 }
  0x89   :  { %v30_v25 = vadd.f32 %v165_v24, %v164_v23 }
  0x8b   :  { %v37_v27 = vadd.f32 %v166_v26, %v30_v25  ;;  %v47_v28 = vpop.permute.xlu1 %46  ;;  %v54_v29 = vpop.permute.xlu0 %53 }
  0x8c   :  { %vm48_vm5 = vcmp.eq.s32.totalorder %v47_v28, %v16_v20  ;;  %vm55_vm6 = vcmp.eq.s32.totalorder %v54_v29, %v16_v20 }
  0x8d   :  { %v44_v31 = vadd.f32 %v167_v30, %v37_v27  ;;  %v168_v32 = vsel %vm48_vm5, 1.0, %v226_v16  ;;  %v169_v34 = vsel %vm55_vm6, 1.0, %v226_v16 }
  0x8f   :  { %v51_v33 = vadd.f32 %v168_v32, %v44_v31 }
  0x90   :  { %v61_v35 = vpop.permute.xlu1 %60 }
  0x91   :  { %vm62_vm7 = vcmp.eq.s32.totalorder %v61_v35, %v16_v20  ;;  %v58_v36 = vadd.f32 %v169_v34, %v51_v33 }
  0x92   :  { %v170_v37 = vsel %vm62_vm7, 1.0, %v226_v16 }
  0x93   :  { %v65_v39 = vadd.f32 %v170_v37, %v58_v36 }
  0x95   :  { %v68_v38 = vpop.permute.xlu1 %67 }
  0x96   :  { %vm69_vm8 = vcmp.eq.s32.totalorder %v68_v38, %v16_v20 }
  0x97   :  { %v171_v40 = vsel %vm69_vm8, 1.0, %v226_v16 }
  0x98   :  { %v72_v41 = vadd.f32 %v171_v40, %v65_v39 }
  0x9a   :  { %188 = vmatmul.mubr.msk.f32.vlgmr.msra.gmra.mrb[0].mxu0 %vm84_vm9, %v72_v41 }
 0x16d   :  { %v154_v43 = vpop.f32.mrb[0].mxu0 }
 0x16e   :  { %v155_v44 = vadd.f32 %v172_v42, %v154_v43  ;;  %v189_v45 = vpop.f32.mrb[1].mxu0 }
 0x170   :  { %159 = vst.msk [vmem:[%s271_s3] sm:$0xff] %vm158_vm10, %v155_v44 }

</bundles_post_ra>
